<compile_context>
chip_gen: v7x
topology: tpu7x:2x2x1
jax: 0.10.0
libtpu: 0.0.40
codegen_flags: <defaults>
</compile_context>

<pallas_src>
import jax
import jax.numpy as jnp
from jax.experimental import pallas as pl
from jax.experimental.pallas import tpu as pltpu

D_IN_RAW = 63     # 21 landmarks * 3 coords
D_IN = 64         # padded contraction dim for layer 1
D_H1 = 128
D_H2 = 64
D_OUT_RAW = 5
D_OUT = 128       # lane-dense padded output width


def _mlp_kernel(x_ref, w1_ref, b1_ref, w2_ref, b2_ref, w3_ref, b3_ref, o_ref):
    # x tile: (TB, 64) bf16. Weights: bf16. Biases: f32. Accumulation: f32 on the MXU.
    x = x_ref[...]

    # Layer 1: Linear(64 -> 128) + ReLU  (zero-padded K row keeps math identical to 63).
    h1 = jnp.dot(x, w1_ref[...], preferred_element_type=jnp.float32) + b1_ref[...]
    h1 = jnp.maximum(h1, 0.0)

    # Layer 2: Linear(128 -> 64) + ReLU
    h2 = jnp.dot(h1.astype(jnp.bfloat16), w2_ref[...],
                 preferred_element_type=jnp.float32) + b2_ref[...]
    h2 = jnp.maximum(h2, 0.0)

    # Layer 3: Linear(64 -> 128)   (columns 5..127 are zero weights/bias -> zero logits).
    o_ref[...] = jnp.dot(h2.astype(jnp.bfloat16), w3_ref[...],
                         preferred_element_type=jnp.float32) + b3_ref[...]


def hand_sign_forward(x, params, *, tb=512):
    """x: (B, 21, 3) float32. Returns logits (B, 5) float32."""
    w1, b1, w2, b2, w3, b3 = params
    B = x.shape[0]

    # Same semantics as torch .view(B, -1): row-major flatten.
    x_flat = x.reshape(B, -1)                                   # (B, 63)

    # Batch tile: >= 8, multiple of 8, at most `tb`.
    TB = min(tb, max(8, ((B + 7) // 8) * 8))
    B_pad = pl.cdiv(B, TB) * TB

    # Pad: batch -> multiple of TB, features 63 -> 64. Cast x to bf16 (halves HBM read).
    x_pad = jnp.pad(x_flat, ((0, B_pad - B), (0, D_IN - D_IN_RAW))).astype(jnp.bfloat16)

    # Prepare weights once: pad K/N and cast matmul operands to bf16; biases stay f32.
    w1p = jnp.pad(w1, ((0, D_IN - D_IN_RAW), (0, 0))).astype(jnp.bfloat16)   # (64, 128)
    w2p = w2.astype(jnp.bfloat16)                                            # (128, 64)
    w3p = jnp.pad(w3, ((0, 0), (0, D_OUT - D_OUT_RAW))).astype(jnp.bfloat16) # (64, 128)
    b1p = b1.astype(jnp.float32)                                             # (1, 128)
    b2p = b2.astype(jnp.float32)                                             # (1, 64)
    b3p = jnp.pad(b3, ((0, 0), (0, D_OUT - D_OUT_RAW))).astype(jnp.float32)  # (1, 128)

    grid = (B_pad // TB,)
    const = lambda i: (0, 0)   # weights/biases: same block every step -> stay resident

    out_padded = pl.pallas_call(
        _mlp_kernel,
        out_shape=jax.ShapeDtypeStruct((B_pad, D_OUT), jnp.float32),
        grid_spec=pltpu.PrefetchScalarGridSpec(
            num_scalar_prefetch=0,
            grid=grid,
            in_specs=[
                pl.BlockSpec((TB, D_IN), lambda i: (i, 0)),     # x tile (streamed)
                pl.BlockSpec((D_IN, D_H1), const),              # w1 (resident)
                pl.BlockSpec((1, D_H1), const),                 # b1
                pl.BlockSpec((D_H1, D_H2), const),              # w2
                pl.BlockSpec((1, D_H2), const),                 # b2
                pl.BlockSpec((D_H2, D_OUT), const),             # w3 (lane-padded)
                pl.BlockSpec((1, D_OUT), const),                # b3 (lane-padded)
            ],
            out_specs=pl.BlockSpec((TB, D_OUT), lambda i: (i, 0)),
        ),
        compiler_params=pltpu.CompilerParams(
            dimension_semantics=("parallel",),                  # 2 TCs on v7x
        ),
    )(x_pad, w1p, b1p, w2p, b2p, w3p, b3p)

    # Drop batch padding and the 123 zero lane-padding columns.
    return out_padded[:B, :D_OUT_RAW]


def init_params(key):
    """Deterministic init mimicking nn.Linear's U(-1/sqrt(fan_in), 1/sqrt(fan_in))."""
    dims = [(D_IN_RAW, D_H1), (D_H1, D_H2), (D_H2, D_OUT_RAW)]
    params = []
    for i, (fan_in, fan_out) in enumerate(dims):
        kw, kb = jax.random.split(jax.random.fold_in(key, i))
        bound = 1.0 / jnp.sqrt(jnp.float32(fan_in))
        w = jax.random.uniform(kw, (fan_in, fan_out), jnp.float32, -bound, bound)
        b = jax.random.uniform(kb, (1, fan_out), jnp.float32, -bound, bound)
        params.extend([w, b])
    return tuple(params)


def _reference_forward_f32(x, params):
    w1, b1, w2, b2, w3, b3 = params
    h = x.reshape(x.shape[0], -1)
    h = jnp.maximum(h @ w1 + b1, 0.0)
    h = jnp.maximum(h @ w2 + b2, 0.0)
    return h @ w3 + b3


def _reference_forward_bf16(x, params):
    """Reference with the same bf16-operand / f32-accumulate casting as the kernel."""
    w1, b1, w2, b2, w3, b3 = params
    h = x.reshape(x.shape[0], -1).astype(jnp.bfloat16)
    h = jnp.dot(h, w1.astype(jnp.bfloat16), preferred_element_type=jnp.float32) + b1
    h = jnp.maximum(h, 0.0)
    h = jnp.dot(h.astype(jnp.bfloat16), w2.astype(jnp.bfloat16),
                preferred_element_type=jnp.float32) + b2
    h = jnp.maximum(h, 0.0)
    return jnp.dot(h.astype(jnp.bfloat16), w3.astype(jnp.bfloat16),
                   preferred_element_type=jnp.float32) + b3


if __name__ == "__main__":
    key = jax.random.PRNGKey(0)
    params = init_params(key)

    # Small example input: batch of 4 hands, 21 landmarks x 3 coords each.
    x = jax.random.normal(jax.random.fold_in(key, 100), (4, 21, 3), jnp.float32)

    out = hand_sign_forward(x, params)
    out = jax.block_until_ready(out)
    assert out.shape == (4, 5)

    # Tight check vs a reference using the identical bf16-in / f32-accumulate recipe.
    ref_bf16 = _reference_forward_bf16(x, params)
    assert jnp.allclose(out, ref_bf16, atol=1e-3, rtol=1e-3)

    # Semantic check vs the pure-f32 PyTorch-equivalent forward (bf16 rounding slack).
    ref_f32 = _reference_forward_f32(x, params)
    assert jnp.allclose(out, ref_f32, atol=5e-2, rtol=5e-2)

    print("KERNEL_OK")
</pallas_src>

<mosaic_0001>
module attributes {stable_mosaic.version = 11 : i64} {
  func.func @_mlp_kernel(%arg0: i32, %arg1: memref<8x64xbf16, #tpu.memory_space<vmem>>, %arg2: memref<64x128xbf16, #tpu.memory_space<vmem>>, %arg3: memref<1x128xf32, #tpu.memory_space<vmem>>, %arg4: memref<128x64xbf16, #tpu.memory_space<vmem>>, %arg5: memref<1x64xf32, #tpu.memory_space<vmem>>, %arg6: memref<64x128xbf16, #tpu.memory_space<vmem>>, %arg7: memref<1x128xf32, #tpu.memory_space<vmem>>, %arg8: memref<8x128xf32, #tpu.memory_space<vmem>>) attributes {dimension_semantics = [#tpu.dimension_semantics<parallel>], iteration_bounds = array<i64: 1>, scalar_prefetch = 0 : i64, scratch_operands = 0 : i64, tpu.core_type = #tpu.core_type<tc>, window_params = [{transform_indices = @transform_0, window_bounds = array<i64: 8, 64>}, {pipeline_mode = #tpu.pipeline_mode<synchronous>, transform_indices = @transform_1, window_bounds = array<i64: 64, 128>}, {pipeline_mode = #tpu.pipeline_mode<synchronous>, transform_indices = @transform_2, window_bounds = array<i64: 1, 128>}, {pipeline_mode = #tpu.pipeline_mode<synchronous>, transform_indices = @transform_3, window_bounds = array<i64: 128, 64>}, {pipeline_mode = #tpu.pipeline_mode<synchronous>, transform_indices = @transform_4, window_bounds = array<i64: 1, 64>}, {pipeline_mode = #tpu.pipeline_mode<synchronous>, transform_indices = @transform_5, window_bounds = array<i64: 64, 128>}, {pipeline_mode = #tpu.pipeline_mode<synchronous>, transform_indices = @transform_6, window_bounds = array<i64: 1, 128>}, {transform_indices = @transform_7, window_bounds = array<i64: 8, 128>}]} {
    %c0 = arith.constant 0 : index
    %c0_0 = arith.constant 0 : index
    %0 = vector.load %arg1[%c0, %c0_0] : memref<8x64xbf16, #tpu.memory_space<vmem>>, vector<8x64xbf16>
    %c0_1 = arith.constant 0 : index
    %c0_2 = arith.constant 0 : index
    %1 = vector.load %arg2[%c0_1, %c0_2] : memref<64x128xbf16, #tpu.memory_space<vmem>>, vector<64x128xbf16>
    %cst = arith.constant dense<0.000000e+00> : vector<8x128xf32>
    %2 = tpu.matmul %0, %1, %cst {dimension_numbers = #tpu.dot_dimension_numbers<[1], [0], [0], [1], [0, 0, 1, 1], [], []>} : vector<8x64xbf16>, vector<64x128xbf16>, vector<8x128xf32> -> vector<8x128xf32>
    %c0_3 = arith.constant 0 : index
    %c0_4 = arith.constant 0 : index
    %3 = vector.load %arg3[%c0_3, %c0_4] : memref<1x128xf32, #tpu.memory_space<vmem>>, vector<1x128xf32>
    %4 = vector.broadcast %3 : vector<1x128xf32> to vector<8x128xf32>
    %5 = arith.addf %2, %4 : vector<8x128xf32>
    %cst_5 = arith.constant 0.000000e+00 : f32
    %6 = vector.broadcast %cst_5 : f32 to vector<8x128xf32>
    %7 = arith.maximumf %5, %6 : vector<8x128xf32>
    %8 = arith.truncf %7 : vector<8x128xf32> to vector<8x128xbf16>
    %c0_6 = arith.constant 0 : index
    %c0_7 = arith.constant 0 : index
    %9 = vector.load %arg4[%c0_6, %c0_7] : memref<128x64xbf16, #tpu.memory_space<vmem>>, vector<128x64xbf16>
    %cst_8 = arith.constant dense<0.000000e+00> : vector<8x64xf32>
    %10 = tpu.matmul %8, %9, %cst_8 {dimension_numbers = #tpu.dot_dimension_numbers<[1], [0], [0], [1], [0, 0, 1, 1], [], []>} : vector<8x128xbf16>, vector<128x64xbf16>, vector<8x64xf32> -> vector<8x64xf32>
    %c0_9 = arith.constant 0 : index
    %c0_10 = arith.constant 0 : index
    %11 = vector.load %arg5[%c0_9, %c0_10] : memref<1x64xf32, #tpu.memory_space<vmem>>, vector<1x64xf32>
    %12 = vector.broadcast %11 : vector<1x64xf32> to vector<8x64xf32>
    %13 = arith.addf %10, %12 : vector<8x64xf32>
    %cst_11 = arith.constant 0.000000e+00 : f32
    %14 = vector.broadcast %cst_11 : f32 to vector<8x64xf32>
    %15 = arith.maximumf %13, %14 : vector<8x64xf32>
    %16 = arith.truncf %15 : vector<8x64xf32> to vector<8x64xbf16>
    %c0_12 = arith.constant 0 : index
    %c0_13 = arith.constant 0 : index
    %17 = vector.load %arg6[%c0_12, %c0_13] : memref<64x128xbf16, #tpu.memory_space<vmem>>, vector<64x128xbf16>
    %cst_14 = arith.constant dense<0.000000e+00> : vector<8x128xf32>
    %18 = tpu.matmul %16, %17, %cst_14 {dimension_numbers = #tpu.dot_dimension_numbers<[1], [0], [0], [1], [0, 0, 1, 1], [], []>} : vector<8x64xbf16>, vector<64x128xbf16>, vector<8x128xf32> -> vector<8x128xf32>
    %c0_15 = arith.constant 0 : index
    %c0_16 = arith.constant 0 : index
    %19 = vector.load %arg7[%c0_15, %c0_16] : memref<1x128xf32, #tpu.memory_space<vmem>>, vector<1x128xf32>
    %20 = vector.broadcast %19 : vector<1x128xf32> to vector<8x128xf32>
    %21 = arith.addf %18, %20 : vector<8x128xf32>
    %c0_17 = arith.constant 0 : index
    %c0_18 = arith.constant 0 : index
    %22 = vector.load %arg8[%c0_17, %c0_18] : memref<8x128xf32, #tpu.memory_space<vmem>>, vector<8x128xf32>
    tpu.vector_store %arg8[%c0_17, %c0_18], %21 {strides = array<i32>} : memref<8x128xf32, #tpu.memory_space<vmem>>, vector<8x128xf32>,
    return
  }
  func.func @transform_0(%arg0: i32) -> (i32, i32) {
    %c0_i32 = arith.constant 0 : i32
    %c0_i32_0 = arith.constant 0 : i32
    return %arg0, %c0_i32 : i32, i32
  }
  func.func @transform_1(%arg0: i32) -> (i32, i32) {
    %c0_i32 = arith.constant 0 : i32
    %c0_i32_0 = arith.constant 0 : i32
    %c0_i32_1 = arith.constant 0 : i32
    return %c0_i32, %c0_i32_0 : i32, i32
  }
  func.func @transform_2(%arg0: i32) -> (i32, i32) {
    %c0_i32 = arith.constant 0 : i32
    %c0_i32_0 = arith.constant 0 : i32
    %c0_i32_1 = arith.constant 0 : i32
    return %c0_i32, %c0_i32_0 : i32, i32
  }
  func.func @transform_3(%arg0: i32) -> (i32, i32) {
    %c0_i32 = arith.constant 0 : i32
    %c0_i32_0 = arith.constant 0 : i32
    %c0_i32_1 = arith.constant 0 : i32
    return %c0_i32, %c0_i32_0 : i32, i32
  }
  func.func @transform_4(%arg0: i32) -> (i32, i32) {
    %c0_i32 = arith.constant 0 : i32
    %c0_i32_0 = arith.constant 0 : i32
    %c0_i32_1 = arith.constant 0 : i32
    return %c0_i32, %c0_i32_0 : i32, i32
  }
  func.func @transform_5(%arg0: i32) -> (i32, i32) {
    %c0_i32 = arith.constant 0 : i32
    %c0_i32_0 = arith.constant 0 : i32
    %c0_i32_1 = arith.constant 0 : i32
    return %c0_i32, %c0_i32_0 : i32, i32
  }
  func.func @transform_6(%arg0: i32) -> (i32, i32) {
    %c0_i32 = arith.constant 0 : i32
    %c0_i32_0 = arith.constant 0 : i32
    %c0_i32_1 = arith.constant 0 : i32
    return %c0_i32, %c0_i32_0 : i32, i32
  }
  func.func @transform_7(%arg0: i32) -> (i32, i32) {
    %c0_i32 = arith.constant 0 : i32
    %c0_i32_0 = arith.constant 0 : i32
    return %arg0, %c0_i32 : i32, i32
  }
}

</mosaic_0001>

<bundles_post_ra>
// kernel: tpu_custom_call.1
= control target key start
LH: loop header
LB: loop body
LE: loop exit
PB: predicated region body
PF: predicated region fallthrough
CT: control target
= control target key end

     0   :  { %v451_v1 = vmov 0.0   ;;  %vm452_vm0 = vmmov 0   ;;  %vm68_vm1 = vcmask 523264   ;;  %s571_s0 = inlined_call_operand.vmem [shape: bf16[8,64], index: 0, kind: input, shape index: {}]   ;;  %s572_s1 = inlined_call_operand.vmem [shape: bf16[64,128], index: 1, kind: input, shape index: {}]   ;;  %s573_s2 = inlined_call_operand.vmem [shape: f32[1,128], index: 2, kind: input, shape index: {}]   ;;  %s574_s3 = inlined_call_operand.vmem [shape: bf16[128,64], index: 3, kind: input, shape index: {}]   ;;  %s575_s4 = inlined_call_operand.vmem [shape: f32[1,64], index: 4, kind: input, shape index: {}]   ;;  %s576_s5 = inlined_call_operand.vmem [shape: bf16[64,128], index: 5, kind: input, shape index: {}]   ;;  %s577_s6 = inlined_call_operand.vmem [shape: f32[1,128], index: 6, kind: input, shape index: {}]   ;;  %s578_s7 = inlined_call_operand.hbm [shape: f32[8,128], index: 7, kind: output, shape index: {}]  }
   0x1   :  { %v411_v0 = vld [vmem:[%s572_s1] sm:$0xff]   ;;  %364 = vmatprep.subr.bf16.mxu0 %v451_v1  ;;  %376 = vmatprep.subr.bf16.mxu1 %v451_v1  ;;  %v412_v2 = vld [vmem:[%s572_s1 + $0x8] sm:$0xff]   ;;  %v413_v4 = vld [vmem:[%s572_s1 + $0x10] sm:$0xff]  }
   0x2   :  { %365 = vmatpush3.bf16.msra.mxu0 %v411_v0  ;;  %372 = vmatprep.mubr.msk.bf16.mxu0 %vm452_vm0, %v451_v1  ;;  %v415_v3 = vld [vmem:[%s574_s3] sm:$0xff]   ;;  %v416_v5 = vld [vmem:[%s574_s3 + $0x8] sm:$0xff]   ;;  %v414_v6 = vld [vmem:[%s572_s1 + $0x18] sm:$0xff]  }
   0x3   :  { %366 = vmatprep.subr.bf16.mxu0 %v451_v1  ;;  %392 = vmatprep.mubr.msk.bf16.mxu1 %vm452_vm0, %v451_v1  ;;  %v417_v7 = vld [vmem:[%s574_s3 + $0x10] sm:$0xff]   ;;  %v28_v8 = vld [vmem:[%s571_s0] sm:$0xf] }
   0x4   :  { %377 = vmatpush3.bf16.msra.mxu1 %v415_v3 }
   0x5   :  { %378 = vmatprep.subr.bf16.mxu1 %v451_v1 }
   0x6   :  { %367 = vmatpush3.bf16.msra.mxu0 %v412_v2 }
   0x7   :  { %368 = vmatprep.subr.bf16.mxu0 %v451_v1 }
   0x8   :  { %379 = vmatpush3.bf16.msra.mxu1 %v416_v5 }
   0x9   :  { %380 = vmatprep.subr.bf16.mxu1 %v451_v1 }
   0xa   :  { %369 = vmatpush3.bf16.msra.mxu0 %v413_v4 }
   0xb   :  { %370 = vmatprep.subr.bf16.mxu0 %v451_v1 }
   0xe   :  { %371 = vmatpush3.bf16.msra.mxu0 %v414_v6 }
   0xf   :  { %12 = vsyncpa [#allocation3], 0  ;;  %381 = vmatpush3.bf16.msra.mxu1 %v417_v7  ;;  %v418_v9 = vld [vmem:[%s574_s3 + $0x18] sm:$0xff]   ;;  %396 = vmatprep.subr.bf16.mxu0 %v451_v1  ;;  %v419_v10 = vld [vmem:[%s574_s3 + $0x20] sm:$0xff]   ;;  %s453_s14 = smov [#allocation2]  }
  0x10   :  { %382 = vmatprep.subr.bf16.mxu1 %v451_v1  ;;  %v420_v11 = vld [vmem:[%s574_s3 + $0x28] sm:$0xff]   ;;  %v421_v12 = vld [vmem:[%s574_s3 + $0x30] sm:$0xff]   ;;  %v422_v13 = vld [vmem:[%s574_s3 + $0x38] sm:$0xff]  }
  0x11   :  { %373 = vmatmul.mubr.msk.bf16.vlgmr.msra.gmra.mrb[0].mxu0 %vm68_vm1, %v28_v8  ;;  %v423_v14 = vld [vmem:[%s576_s5] sm:$0xff]   ;;  %v424_v15 = vld [vmem:[%s576_s5 + $0x8] sm:$0xff]   ;;  %v425_v24 = vld [vmem:[%s576_s5 + $0x10] sm:$0xff]  }
  0x12   :  { %404 = vmatprep.mubr.msk.bf16.mxu0 %vm452_vm0, %v451_v1  ;;  %397 = vmatpush3.bf16.msra.mxu0 %v423_v14  ;;  %v324_v16 = vld [vmem:[%s573_s2] ss:$0 sm:$0xff]  ;;  %v426_v25 = vld [vmem:[%s576_s5 + $0x18] sm:$0xff]   ;;  %s316_s5 = sshll.u32 %s453_s14, 4  ;;  %s317_s5 = int_to_ptr.vmem [resolvable:$true] %s316_s5 }
  0x13   :  { %383 = vmatpush3.bf16.msra.mxu1 %v418_v9  ;;  %398 = vmatprep.subr.bf16.mxu0 %v451_v1  ;;  %v330_v26 = vld [vmem:[%s575_s4] ss:$0 sm:$0xff]  ;;  %s427_s4 = scalar_lea.vmem %s317_s5, 128  ;;  %p432_p1 = scmp.lt.s32.totalorder %s317_s5, %s317_s5 }
  0x14   :  { %384 = vmatprep.subr.bf16.mxu1 %v451_v1  ;;  %v339_v34 = vld [vmem:[%s577_s6] ss:$0 sm:$0xff]  ;;  %p428_p0 = scmp.ne.s32.totalorder %s317_s5, %s427_s4  ;;  %p433_p2 = scmp.lt.s32.totalorder %s427_s4, %s427_s4 }
  0x16   :  { %399 = vmatpush3.bf16.msra.mxu0 %v424_v15  ;;  %p434_p3 = por %p433_p2, %p432_p1 }
  0x17   :  { %385 = vmatpush3.bf16.msra.mxu1 %v419_v10  ;;  %400 = vmatprep.subr.bf16.mxu0 %v451_v1 }
  0x18   :  { %386 = vmatprep.subr.bf16.mxu1 %v451_v1  ;;  %p435_p4 = pnand %p434_p3, %p428_p0 }
  0x1a   :  { %401 = vmatpush3.bf16.msra.mxu0 %v425_v24 }
  0x1b   :  { %387 = vmatpush3.bf16.msra.mxu1 %v420_v11  ;;  %402 = vmatprep.subr.bf16.mxu0 %v451_v1 }
  0x1c   :  { %388 = vmatprep.subr.bf16.mxu1 %v451_v1 }
  0x1e   :  { %403 = vmatpush3.bf16.msra.mxu0 %v426_v25 }
  0x1f   :  { %389 = vmatpush3.bf16.msra.mxu1 %v421_v12 }
  0x20   :  { %390 = vmatprep.subr.bf16.mxu1 %v451_v1 }
  0x23   :  { %391 = vmatpush3.bf16.msra.mxu1 %v422_v13 }
  0xe4   :  { %v106_v17 = vpop.f32.mrb[0].mxu0 }
  0xe5   :  { %v107_v18 = vadd.f32 %v324_v16, %v106_v17  ;;  %v374_v19 = vpop.f32.mrb[1].mxu0 }
  0xe6   :  { %v109_v20 = vpop.f32.mrb[2].mxu0 }
  0xe7   :  { %v112_v21 = vmax.f32 %v107_v18, 0.0  ;;  %v375_v22 = vpop.f32.mrb[3].mxu0 }
  0xe9   :  { %v113_v23 = vpack.c.bf16 %v112_v21, %v112_v21 }
  0xeb   :  { %393 = vmatmul.mubr.bf16.vlgmr.msra.gmra.mrb[0].mxu1 %v113_v23 }
 0x1be   :  { %v219_v27 = vpop.f32.mrb[0].mxu1 }
 0x1bf   :  { %v220_v28 = vadd.f32 %v330_v26, %v219_v27  ;;  %v394_v29 = vpop.f32.mrb[1].mxu1 }
 0x1c0   :  { %v222_v30 = vpop.f32.mrb[2].mxu1 }
 0x1c1   :  { %v225_v31 = vmax.f32 %v220_v28, 0.0  ;;  %v395_v32 = vpop.f32.mrb[3].mxu1 }
 0x1c3   :  { %v226_v33 = vpack.c.bf16 %v225_v31, %v225_v31 }
 0x1c5   :  { %405 = vmatmul.mubr.msk.bf16.vlgmr.msra.gmra.mrb[4].mxu0 %vm68_vm1, %v226_v33 }
 0x298   :  { %v303_v35 = vpop.f32.mrb[4].mxu0 }
 0x299   :  { %v304_v36 = vadd.f32 %v339_v34, %v303_v35  ;;  %v406_v37 = vpop.f32.mrb[5].mxu0 }
 0x29a   :  { %v306_v38 = vpop.f32.mrb[6].mxu0 }
 0x29b   :  { %309 = vst [vmem:[#allocation2] sm:$0xff] %v304_v36  ;;  %v407_v39 = vpop.f32.mrb[7].mxu0 }
 0x29c   :  { %438 = shalt.err (!%p435_p4)
}
 0x29d   :  { %s439_s6 = scalar_lea.hbm %s578_s7, 128 }
 0x29e   :  { %p440_p5 = scmp.ne.s32.totalorder %s578_s7, %s439_s6  ;;  %p443_p6 = scmp.lt.u32.totalorder %s439_s6, %s578_s7 }
 0x2a0   :  { %p445_p7 = pnand %p443_p6, %p440_p5 }
 0x2a2   :  { %448 = shalt.err (!%p445_p7)
}
 0x2a3   :  { %319 = dma.vmem_to_hbm [thread:$0]  %s317_s5, 128, %s578_s7, [#allocation3]  }
 0x2a4   :  { %449 = dma.done.wait [#allocation3], 128  }
 0x2a5   :  { %450 = vsyncadd [#allocation3], 4294967168 }
 0x2a6   :  { %323 = vsyncpa [#allocation3], 1 }

</bundles_post_ra>
